<compile_context>
chip_gen: v6e
topology: v6e:2x2x1
jax: 0.10.0
libtpu: 0.0.40
codegen_flags: <defaults>
</compile_context>

<pallas_src>
import jax
import jax.numpy as jnp
from jax.experimental import pallas as pl
from jax.experimental.pallas import tpu as pltpu


def _round_up(n, m):
    return ((n + m - 1) // m) * m


def mlp_kernel(x_ref, w1_ref, b1_ref, w2_ref, b2_ref, w3t_ref, b3_ref, o_ref):
    """One batch tile: relu(relu(relu(x@W1+b1)@W2+b2) . w3 + b3) -> (TM, 1)."""
    x = x_ref[...]

    # fc1 + ReLU: matmul in the weight dtype (bf16 feeds the MXU natively),
    # f32 accumulation / bias / ReLU.
    h = jnp.dot(x.astype(w1_ref.dtype), w1_ref[...],
                preferred_element_type=jnp.float32)
    h = jnp.maximum(h + b1_ref[...], 0.0)

    # fc2 + ReLU
    h = jnp.dot(h.astype(w2_ref.dtype), w2_ref[...],
                preferred_element_type=jnp.float32)
    h = jnp.maximum(h + b2_ref[...], 0.0)

    # fc3 (nodes -> 1) + ReLU: VPU multiply + cross-lane reduce (XLU) writing a
    # narrow (TM, 1) column directly -- no 128-wide output slab.
    y = jnp.sum(h * w3t_ref[...], axis=-1, keepdims=True) + b3_ref[...]
    o_ref[...] = jnp.maximum(y, 0.0).astype(o_ref.dtype)


def prepare_params(params, weight_dtype=jnp.bfloat16):
    """One-time parameter prep (do this once and reuse across calls):
    cast the two matmul weights to the MXU dtype, pre-transpose w3 to a
    (1, nodes) row for the VPU fc3 path, keep biases in f32."""
    return {
        "w1": params["w1"].astype(weight_dtype),
        "b1": params["b1"].reshape(1, -1).astype(jnp.float32),
        "w2": params["w2"].astype(weight_dtype),
        "b2": params["b2"].reshape(1, -1).astype(jnp.float32),
        "w3t": params["w3"].reshape(1, -1).astype(jnp.float32),
        "b3": params["b3"].reshape(1, 1).astype(jnp.float32),
    }


def my_small_model(x, prepared, *, min_pallas_batch=64, force_pallas=False):
    """x: (B, nodes) f32. prepared: output of prepare_params. Returns (B, 1)."""
    w1, b1 = prepared["w1"], prepared["b1"]
    w2, b2 = prepared["w2"], prepared["b2"]
    w3t, b3 = prepared["w3t"], prepared["b3"]

    B, nodes = x.shape
    hidden = w1.shape[1]

    # Tiny-batch fallback: three small dots fuse better in plain XLA than a
    # custom call + DMA setup for an MLP this small.
    if B < min_pallas_batch and not force_pallas:
        h = jnp.maximum(x @ w1.astype(jnp.float32) + b1, 0.0)
        h = jnp.maximum(h @ w2.astype(jnp.float32) + b2, 0.0)
        return jnp.maximum(jnp.sum(h * w3t, axis=-1, keepdims=True) + b3, 0.0)

    # Batch tiling: cap tiles at 512 rows (better HBM-roofline fraction than
    # 256), and guarantee >= 2 grid steps at B >= 256 so v7x's two TensorCores
    # both get work under dimension_semantics=("parallel",).
    if B >= 256:
        ntiles = max(2, pl.cdiv(B, 512))
        TM = _round_up(pl.cdiv(B, ntiles), 8)
    else:
        TM = _round_up(B, 8)
    B_p = _round_up(B, TM)

    # Only the batch dim is padded (zero rows; exact: ReLU(0 + b) rows are
    # sliced away below). Feature dims stay at their true sizes.
    xp = x if B_p == B else jnp.zeros((B_p, nodes), x.dtype).at[:B].set(x)

    grid = (B_p // TM,)

    w_itemsize = jnp.dtype(w1.dtype).itemsize
    flops = 2 * B * (nodes * hidden + hidden * nodes + nodes)
    bytes_accessed = (4 * (B_p * nodes + B_p * 1 + hidden + nodes + nodes + 1)
                      + w_itemsize * (nodes * hidden + hidden * nodes))

    out_p = pl.pallas_call(
        mlp_kernel,
        out_shape=jax.ShapeDtypeStruct((B_p, 1), jnp.float32),
        grid=grid,
        in_specs=[
            # x: tiled over batch, full-extent (unpadded) feature dim.
            pl.BlockSpec((TM, nodes), lambda i: (i, 0)),
            # weights / biases: full arrays, resident across all grid steps.
            pl.BlockSpec((nodes, hidden), lambda i: (0, 0)),
            pl.BlockSpec((1, hidden), lambda i: (0, 0)),
            pl.BlockSpec((hidden, nodes), lambda i: (0, 0)),
            pl.BlockSpec((1, nodes), lambda i: (0, 0)),
            pl.BlockSpec((1, nodes), lambda i: (0, 0)),   # w3 transposed row
            pl.BlockSpec((1, 1), lambda i: (0, 0)),
        ],
        out_specs=pl.BlockSpec((TM, 1), lambda i: (i, 0)),
        compiler_params=pltpu.CompilerParams(
            dimension_semantics=("parallel",),
        ),
        cost_estimate=pl.CostEstimate(
            flops=flops, transcendentals=0, bytes_accessed=bytes_accessed),
    )(xp, w1, b1, w2, b2, w3t, b3)

    return out_p[:B]


def init_params(key, nodes):
    """Deterministic init mirroring nn.Linear shapes (weights stored (in, out))."""
    hidden = nodes * 2
    k1, k2, k3, k4, k5, k6 = jax.random.split(key, 6)
    s1 = 1.0 / jnp.sqrt(nodes)
    s2 = 1.0 / jnp.sqrt(hidden)
    s3 = 1.0 / jnp.sqrt(nodes)
    return {
        "w1": jax.random.uniform(k1, (nodes, hidden), jnp.float32, -s1, s1),
        "b1": jax.random.uniform(k2, (1, hidden), jnp.float32, -s1, s1),
        "w2": jax.random.uniform(k3, (hidden, nodes), jnp.float32, -s2, s2),
        "b2": jax.random.uniform(k4, (1, nodes), jnp.float32, -s2, s2),
        "w3": jax.random.uniform(k5, (nodes, 1), jnp.float32, -s3, s3),
        "b3": jax.random.uniform(k6, (1, 1), jnp.float32, -s3, s3),
    }


def reference(x, p):
    h = jnp.maximum(x @ p["w1"] + p["b1"], 0.0)
    h = jnp.maximum(h @ p["w2"] + p["b2"], 0.0)
    h = jnp.maximum(h @ p["w3"] + p["b3"], 0.0)
    return h


if __name__ == "__main__":
    key = jax.random.PRNGKey(0)
    kx, kp, kx2, kx3 = jax.random.split(key, 4)
    batch, nodes = 8, 32  # nodes=32 -> hidden=64 -> out=1
    x = jax.random.normal(kx, (batch, nodes), jnp.float32)
    params = init_params(kp, nodes)
    ref = reference(x, params)

    # 1) f32-weight Pallas path (forced past the tiny-batch fallback so the
    #    kernel itself is exercised): close to PyTorch f32 semantics.
    p_f32 = prepare_params(params, weight_dtype=jnp.float32)
    out = jax.block_until_ready(my_small_model(x, p_f32, force_pallas=True))
    assert out.shape == (batch, 1), out.shape
    assert jnp.allclose(out, ref, atol=1e-5, rtol=1e-5), "f32 mismatch vs reference"

    # 2) default bf16-weight path (MXU-native on v5e/v6e/v7x), f32 accumulation.
    p_bf16 = prepare_params(params)  # cast once; reuse across calls
    out_bf = jax.block_until_ready(my_small_model(x, p_bf16, force_pallas=True))
    assert jnp.allclose(out_bf, ref, atol=5e-2, rtol=5e-2), "bf16 mismatch"

    # 3) larger batch: B >= 256 -> TM=136, grid=(2,) (both v7x TCs busy), no
    #    feature padding, narrow (TM, 1) output stores.
    batch2 = 272
    x2 = jax.random.normal(kx2, (batch2, nodes), jnp.float32)
    out2 = jax.block_until_ready(my_small_model(x2, p_f32))
    assert out2.shape == (batch2, 1), out2.shape
    assert jnp.allclose(out2, reference(x2, params), atol=1e-5, rtol=1e-5), \
        "tiled-batch mismatch vs reference"

    # 4) tiny-batch fallback path (plain XLA, no custom call).
    x3 = jax.random.normal(kx3, (16, nodes), jnp.float32)
    out3 = jax.block_until_ready(my_small_model(x3, p_f32))
    assert jnp.allclose(out3, reference(x3, params), atol=1e-5, rtol=1e-5), \
        "fallback mismatch vs reference"

    print("KERNEL_OK")
</pallas_src>

<mosaic_0001>
module attributes {stable_mosaic.version = 11 : i64} {
  func.func @mlp_kernel(%arg0: i32, %arg1: memref<8x32xf32, #tpu.memory_space<vmem>>, %arg2: memref<32x64xf32, #tpu.memory_space<vmem>>, %arg3: memref<1x64xf32, #tpu.memory_space<vmem>>, %arg4: memref<64x32xf32, #tpu.memory_space<vmem>>, %arg5: memref<1x32xf32, #tpu.memory_space<vmem>>, %arg6: memref<1x32xf32, #tpu.memory_space<vmem>>, %arg7: memref<1x1xf32, #tpu.memory_space<vmem>>, %arg8: memref<8x1xf32, #tpu.memory_space<vmem>>) attributes {dimension_semantics = [#tpu.dimension_semantics<parallel>], iteration_bounds = array<i64: 1>, scalar_prefetch = 0 : i64, scratch_operands = 0 : i64, tpu.core_type = #tpu.core_type<tc>, window_params = [{transform_indices = @transform_0, window_bounds = array<i64: 8, 32>}, {pipeline_mode = #tpu.pipeline_mode<synchronous>, transform_indices = @transform_1, window_bounds = array<i64: 32, 64>}, {pipeline_mode = #tpu.pipeline_mode<synchronous>, transform_indices = @transform_2, window_bounds = array<i64: 1, 64>}, {pipeline_mode = #tpu.pipeline_mode<synchronous>, transform_indices = @transform_3, window_bounds = array<i64: 64, 32>}, {pipeline_mode = #tpu.pipeline_mode<synchronous>, transform_indices = @transform_4, window_bounds = array<i64: 1, 32>}, {pipeline_mode = #tpu.pipeline_mode<synchronous>, transform_indices = @transform_5, window_bounds = array<i64: 1, 32>}, {pipeline_mode = #tpu.pipeline_mode<synchronous>, transform_indices = @transform_6, window_bounds = array<i64: 1, 1>}, {transform_indices = @transform_7, window_bounds = array<i64: 8, 1>}]} {
    %c0 = arith.constant 0 : index
    %c0_0 = arith.constant 0 : index
    %0 = vector.load %arg1[%c0, %c0_0] : memref<8x32xf32, #tpu.memory_space<vmem>>, vector<8x32xf32>
    %c0_1 = arith.constant 0 : index
    %c0_2 = arith.constant 0 : index
    %1 = vector.load %arg2[%c0_1, %c0_2] : memref<32x64xf32, #tpu.memory_space<vmem>>, vector<32x64xf32>
    %cst = arith.constant dense<0.000000e+00> : vector<8x64xf32>
    %2 = tpu.matmul %0, %1, %cst {dimension_numbers = #tpu.dot_dimension_numbers<[1], [0], [0], [1], [0, 0, 1, 1], [], []>} : vector<8x32xf32>, vector<32x64xf32>, vector<8x64xf32> -> vector<8x64xf32>
    %c0_3 = arith.constant 0 : index
    %c0_4 = arith.constant 0 : index
    %3 = vector.load %arg3[%c0_3, %c0_4] : memref<1x64xf32, #tpu.memory_space<vmem>>, vector<1x64xf32>
    %4 = vector.broadcast %3 : vector<1x64xf32> to vector<8x64xf32>
    %5 = arith.addf %2, %4 : vector<8x64xf32>
    %cst_5 = arith.constant 0.000000e+00 : f32
    %6 = vector.broadcast %cst_5 : f32 to vector<8x64xf32>
    %7 = arith.maximumf %5, %6 : vector<8x64xf32>
    %c0_6 = arith.constant 0 : index
    %c0_7 = arith.constant 0 : index
    %8 = vector.load %arg4[%c0_6, %c0_7] : memref<64x32xf32, #tpu.memory_space<vmem>>, vector<64x32xf32>
    %cst_8 = arith.constant dense<0.000000e+00> : vector<8x32xf32>
    %9 = tpu.matmul %7, %8, %cst_8 {dimension_numbers = #tpu.dot_dimension_numbers<[1], [0], [0], [1], [0, 0, 1, 1], [], []>} : vector<8x64xf32>, vector<64x32xf32>, vector<8x32xf32> -> vector<8x32xf32>
    %c0_9 = arith.constant 0 : index
    %c0_10 = arith.constant 0 : index
    %10 = vector.load %arg5[%c0_9, %c0_10] : memref<1x32xf32, #tpu.memory_space<vmem>>, vector<1x32xf32>
    %11 = vector.broadcast %10 : vector<1x32xf32> to vector<8x32xf32>
    %12 = arith.addf %9, %11 : vector<8x32xf32>
    %cst_11 = arith.constant 0.000000e+00 : f32
    %13 = vector.broadcast %cst_11 : f32 to vector<8x32xf32>
    %14 = arith.maximumf %12, %13 : vector<8x32xf32>
    %c0_12 = arith.constant 0 : index
    %c0_13 = arith.constant 0 : index
    %15 = vector.load %arg6[%c0_12, %c0_13] : memref<1x32xf32, #tpu.memory_space<vmem>>, vector<1x32xf32>
    %16 = vector.broadcast %15 : vector<1x32xf32> to vector<8x32xf32>
    %17 = arith.mulf %14, %16 : vector<8x32xf32>
    %cst_14 = arith.constant dense<0.000000e+00> : vector<8xf32>
    %18 = vector.multi_reduction <add>, %17, %cst_14 [1] : vector<8x32xf32> to vector<8xf32>
    %19 = vector.shape_cast %18 : vector<8xf32> to vector<8x1xf32>
    %c0_15 = arith.constant 0 : index
    %c0_16 = arith.constant 0 : index
    %20 = vector.load %arg7[%c0_15, %c0_16] : memref<1x1xf32, #tpu.memory_space<vmem>>, vector<1x1xf32>
    %21 = vector.broadcast %20 : vector<1x1xf32> to vector<8x1xf32>
    %22 = arith.addf %19, %21 : vector<8x1xf32>
    %cst_17 = arith.constant 0.000000e+00 : f32
    %23 = vector.broadcast %cst_17 : f32 to vector<8x1xf32>
    %24 = arith.maximumf %22, %23 : vector<8x1xf32>
    %c0_18 = arith.constant 0 : index
    %c0_19 = arith.constant 0 : index
    %25 = vector.load %arg8[%c0_18, %c0_19] : memref<8x1xf32, #tpu.memory_space<vmem>>, vector<8x1xf32>
    tpu.vector_store %arg8[%c0_18, %c0_19], %24 {strides = array<i32>} : memref<8x1xf32, #tpu.memory_space<vmem>>, vector<8x1xf32>,
    return
  }
  func.func @transform_0(%arg0: i32) -> (i32, i32) {
    %c0_i32 = arith.constant 0 : i32
    %c0_i32_0 = arith.constant 0 : i32
    return %arg0, %c0_i32 : i32, i32
  }
  func.func @transform_1(%arg0: i32) -> (i32, i32) {
    %c0_i32 = arith.constant 0 : i32
    %c0_i32_0 = arith.constant 0 : i32
    %c0_i32_1 = arith.constant 0 : i32
    return %c0_i32, %c0_i32_0 : i32, i32
  }
  func.func @transform_2(%arg0: i32) -> (i32, i32) {
    %c0_i32 = arith.constant 0 : i32
    %c0_i32_0 = arith.constant 0 : i32
    %c0_i32_1 = arith.constant 0 : i32
    return %c0_i32, %c0_i32_0 : i32, i32
  }
  func.func @transform_3(%arg0: i32) -> (i32, i32) {
    %c0_i32 = arith.constant 0 : i32
    %c0_i32_0 = arith.constant 0 : i32
    %c0_i32_1 = arith.constant 0 : i32
    return %c0_i32, %c0_i32_0 : i32, i32
  }
  func.func @transform_4(%arg0: i32) -> (i32, i32) {
    %c0_i32 = arith.constant 0 : i32
    %c0_i32_0 = arith.constant 0 : i32
    %c0_i32_1 = arith.constant 0 : i32
    return %c0_i32, %c0_i32_0 : i32, i32
  }
  func.func @transform_5(%arg0: i32) -> (i32, i32) {
    %c0_i32 = arith.constant 0 : i32
    %c0_i32_0 = arith.constant 0 : i32
    %c0_i32_1 = arith.constant 0 : i32
    return %c0_i32, %c0_i32_0 : i32, i32
  }
  func.func @transform_6(%arg0: i32) -> (i32, i32) {
    %c0_i32 = arith.constant 0 : i32
    %c0_i32_0 = arith.constant 0 : i32
    %c0_i32_1 = arith.constant 0 : i32
    return %c0_i32, %c0_i32_0 : i32, i32
  }
  func.func @transform_7(%arg0: i32) -> (i32, i32) {
    %c0_i32 = arith.constant 0 : i32
    %c0_i32_0 = arith.constant 0 : i32
    return %arg0, %c0_i32 : i32, i32
  }
}

</mosaic_0001>

<bundles_post_ra>
// kernel: tpu_custom_call.1
= control target key start
LH: loop header
LB: loop body
LE: loop exit
PB: predicated region body
PF: predicated region fallthrough
CT: control target
= control target key end

     0   :  { %v283_v0 = vmov 0.0   ;;  %vm284_vm0 = vmmov 0   ;;  %vm40_vm1 = vcmask 261120   ;;  %vm130_vm2 = vcmask 523264   ;;  %s383_s1 = inlined_call_operand.vmem [shape: f32[32,64], index: 1, kind: input, shape index: {}]   ;;  %s384_s3 = inlined_call_operand.vmem [shape: f32[64,32], index: 3, kind: input, shape index: {}]   ;;  %s385_s0 = inlined_call_operand.vmem [shape: f32[8,32], index: 0, kind: input, shape index: {}]   ;;  %s386_s2 = inlined_call_operand.vmem [shape: f32[1,64], index: 2, kind: input, shape index: {}]   ;;  %s387_s6 = inlined_call_operand.<no memory space> [shape: f32[1,1], index: 6, kind: input, shape index: {}]   ;;  %s388_s4 = inlined_call_operand.vmem [shape: f32[1,32], index: 4, kind: input, shape index: {}]   ;;  %s389_s5 = inlined_call_operand.vmem [shape: f32[1,32], index: 5, kind: input, shape index: {}]   ;;  %s390_s7 = inlined_call_operand.vmem [shape: f32[8,1], index: 7, kind: output, shape index: {}]  }
   0x1   :  { %251 = vmatprep.subr.mxu0 %v283_v0  ;;  %v32_v1 = vld [vmem:[%s383_s1 + $0x18] sm:$0xff]  ;;  %v31_v2 = vld [vmem:[%s383_s1 + $0x10] sm:$0xff]  ;;  %259 = vmatprep.mubr.msk.f32.mxu0 %vm284_vm0, %v283_v0  ;;  %v30_v4 = vld [vmem:[%s383_s1 + $0x8] sm:$0xff]  ;;  %v12_v19 = vstv %s387_s6  ;;  %vm225_vm3 = vcmask 7168  }
   0x2   :  { %252 = vmatpush3.msra.mxu0 %v32_v1  ;;  %262 = vmatprep.subr.mxu1 %v283_v0  ;;  %v122_v3 = vld [vmem:[%s384_s3 + $0x38] sm:$0xff]  ;;  %v121_v5 = vld [vmem:[%s384_s3 + $0x30] sm:$0xff]  ;;  %v120_v6 = vld [vmem:[%s384_s3 + $0x28] sm:$0xff]  ;;  %13 = vst [vmem:[#allocation2] sm:$0x1] %v12_v19 }
   0x3   :  { %253 = vmatprep.subr.mxu0 %v283_v0  ;;  %263 = vmatpush3.msra.mxu1 %v122_v3  ;;  %v29_v7 = vld [vmem:[%s383_s1] sm:$0xff]  ;;  %v118_v10 = vld [vmem:[%s384_s3 + $0x18] sm:$0xff]  ;;  %v117_v11 = vld [vmem:[%s384_s3 + $0x10] sm:$0xff] }
   0x4   :  { %254 = vmatpush3.msra.mxu0 %v31_v2  ;;  %264 = vmatprep.subr.mxu1 %v283_v0  ;;  %v28_v8 = vld [vmem:[%s385_s0] sm:$0xff]  ;;  %v116_v12 = vld [vmem:[%s384_s3 + $0x8] sm:$0xff] }
   0x5   :  { %255 = vmatprep.subr.mxu0 %v283_v0  ;;  %265 = vmatpush3.msra.mxu1 %v121_v5  ;;  %v119_v9 = vld [vmem:[%s384_s3 + $0x20] sm:$0xff] }
   0x6   :  { %256 = vmatpush3.msra.mxu0 %v30_v4  ;;  %266 = vmatprep.subr.mxu1 %v283_v0  ;;  %v115_v13 = vld [vmem:[%s384_s3] sm:$0xff] }
   0x7   :  { %257 = vmatprep.subr.mxu0 %v283_v0  ;;  %267 = vmatpush3.msra.mxu1 %v120_v6  ;;  %v231_v14 = vld [vmem:[%s386_s2] ss:$0 sm:$0xff] }
   0x8   :  { %258 = vmatpush3.msra.mxu0 %v29_v7  ;;  %268 = vmatprep.subr.mxu1 %v283_v0  ;;  %v233_v20 = vld [vmem:[%s388_s4] ss:$0 sm:$0xff] }
   0x9   :  { %260 = vmatmul.mubr.msk.f32.vlgmr.msra.gmra.mxu0 %vm40_vm1, %v28_v8  ;;  %269 = vmatpush3.msra.mxu1 %v119_v9  ;;  %v235_v24 = vld [vmem:[%s389_s5] ss:$0 sm:$0xff] }
   0xa   :  { %270 = vmatprep.subr.mxu1 %v283_v0  ;;  %278 = vmatprep.mubr.msk.f32.mxu1 %vm284_vm0, %v283_v0  ;;  %v236_v28 = vld [vmem:[#allocation2] ss:$0 sm:$0xff] }
   0xb   :  { %271 = vmatpush3.msra.mxu1 %v118_v10 }
   0xc   :  { %272 = vmatprep.subr.mxu1 %v283_v0 }
   0xd   :  { %273 = vmatpush3.msra.mxu1 %v117_v11 }
   0xe   :  { %274 = vmatprep.subr.mxu1 %v283_v0 }
   0xf   :  { %275 = vmatpush3.msra.mxu1 %v116_v12 }
  0x10   :  { %276 = vmatprep.subr.mxu1 %v283_v0 }
  0x11   :  { %277 = vmatpush3.msra.mxu1 %v115_v13 }
  0xc9   :  { %v110_v15 = vpop.f32.mrf.mxu0 }
  0xca   :  { %v111_v16 = vadd.f32 %v231_v14, %v110_v15 }
  0xcb   :  { %v261_v17 = vpop.f32.mrf.mxu0 }
  0xcc   :  { %v114_v18 = vmax.f32 %v111_v16, 0.0 }
  0xce   :  { %279 = vmatmul.mubr.msk.f32.vlgmr.msra.gmra.mxu1 %vm130_vm2, %v114_v18 }
 0x18e   :  { %v200_v21 = vpop.f32.mrf.mxu1 }
 0x18f   :  { %v201_v22 = vadd.f32 %v233_v20, %v200_v21 }
 0x190   :  { %v280_v23 = vpop.f32.mrf.mxu1 }
 0x191   :  { %v204_v25 = vmax.f32 %v201_v22, 0.0 }
 0x193   :  { %v212_v26 = vmul.f32 %v235_v24, %v204_v25 }
 0x195   :  { %v213_v27 = vsel %vm40_vm1, %v212_v26, 0.0 }
 0x196   :  { %214 = vadd.xlane.f32.xlu0 %v213_v27 }
 0x21f   :  { %v215_v29 = vpop.xlane.xlu0 %214 }
 0x220   :  { %v223_v30 = vadd.f32 %v236_v28, %v215_v29 }
 0x222   :  { %v224_v31 = vmax.f32 %v223_v30, 0.0 }
 0x224   :  { %226 = vst.msk [vmem:[%s390_s7] sm:$0xff] %vm225_vm3, %v224_v31 }

</bundles_post_ra>
